<compile_context>
chip_gen: v7x
topology: tpu7x:2x2x1
jax: 0.10.0
libtpu: 0.0.40
codegen_flags: <defaults>
</compile_context>

<pallas_src>
import functools

import jax
import jax.numpy as jnp
from jax.experimental import pallas as pl
from jax.experimental.pallas import tpu as pltpu


def _round_up(x, m):
    return (x + m - 1) // m * m


def _mlp_kernel(x_ref, w_ref, o_ref):
    # out = relu(x @ (w1 @ w2)); single MXU push, f32 accumulation, fused ReLU.
    y = jnp.dot(x_ref[...], w_ref[...], preferred_element_type=jnp.float32)
    o_ref[...] = jnp.maximum(y, 0.0).astype(o_ref.dtype)


@functools.partial(jax.jit, static_argnames=("tb",))
def mlp_top_model(x, w1, w2, *, tb=None):
    """x: (B, i_f) f32; w1: (i_f, 20) f32; w2: (20, o_f) f32 -> (B, o_f) f32."""
    B, i_f = x.shape
    o_f = w2.shape[1]

    # Fold the two bias-free linear layers (no nonlinearity in between).
    w = jnp.dot(w1, w2, preferred_element_type=jnp.float32)  # (i_f, o_f)

    # Batch tile: ~2 MiB of x per block (double-buffered -> ~4 MiB VMEM),
    # multiple of 8 sublanes, never larger than needed for small B.
    if tb is None:
        tb = (2 << 20) // max(1, i_f * 4)
        tb = max(8, min(1024, tb))
    tb = max(8, min(int(tb), _round_up(B, 8)))
    tb = _round_up(tb, 8)

    out = pl.pallas_call(
        _mlp_kernel,
        out_shape=jax.ShapeDtypeStruct((B, o_f), jnp.float32),
        grid=(pl.cdiv(B, tb),),
        in_specs=[
            pl.BlockSpec((tb, i_f), lambda i: (i, 0)),    # x tile, pipelined over B
            pl.BlockSpec((i_f, o_f), lambda i: (0, 0)),   # folded weight, VMEM-resident
        ],
        out_specs=pl.BlockSpec((tb, o_f), lambda i: (i, 0)),
        compiler_params=pltpu.CompilerParams(
            dimension_semantics=("parallel",),
        ),
    )(x, w)
    return out


def xavier_normal(key, fan_out, fan_in):
    # matches torch.nn.init.xavier_normal_ for a (fan_out, fan_in) weight
    std = (2.0 / (fan_in + fan_out)) ** 0.5
    return jax.random.normal(key, (fan_out, fan_in), dtype=jnp.float32) * std


if __name__ == "__main__":
    B, i_f, hidden, o_f = 8, 32, 20, 16

    key = jax.random.PRNGKey(0)
    kx, k1, k2 = jax.random.split(key, 3)

    x = jax.random.normal(kx, (B, i_f), dtype=jnp.float32)

    # PyTorch Linear stores weight as (out_features, in_features); init in that
    # layout (so the xavier fan computation matches), then transpose for x @ w.
    w1_pt = xavier_normal(k1, hidden, i_f)   # (20, i_f)
    w2_pt = xavier_normal(k2, o_f, hidden)   # (o_f, 20)
    w1 = w1_pt.T                              # (i_f, 20)
    w2 = w2_pt.T                              # (20, o_f)

    out = jax.block_until_ready(mlp_top_model(x, w1, w2))
    assert out.shape == (B, o_f)

    # Semantics check vs. the unfolded f32 reference (fold is exact modulo fp
    # reassociation / MXU accumulation order).
    ref_f32 = jnp.maximum((x @ w1) @ w2, 0.0)
    err = float(jnp.max(jnp.abs(out - ref_f32)))
    assert jnp.allclose(out, ref_f32, atol=1e-2, rtol=1e-2), err

    # Tighter check vs. the same folded formulation.
    ref_fold = jnp.maximum(x @ (w1 @ w2), 0.0)
    assert jnp.allclose(out, ref_fold, atol=1e-2, rtol=1e-2)

    print("KERNEL_OK")
</pallas_src>

<mosaic_0001>
module attributes {stable_mosaic.version = 11 : i64} {
  func.func @_mlp_kernel(%arg0: i32, %arg1: memref<8x32xf32, #tpu.memory_space<vmem>>, %arg2: memref<32x16xf32, #tpu.memory_space<vmem>>, %arg3: memref<8x16xf32, #tpu.memory_space<vmem>>) attributes {dimension_semantics = [#tpu.dimension_semantics<parallel>], iteration_bounds = array<i64: 1>, scalar_prefetch = 0 : i64, scratch_operands = 0 : i64, tpu.core_type = #tpu.core_type<tc>, window_params = [{transform_indices = @transform_0, window_bounds = array<i64: 8, 32>}, {pipeline_mode = #tpu.pipeline_mode<synchronous>, transform_indices = @transform_1, window_bounds = array<i64: 32, 16>}, {transform_indices = @transform_2, window_bounds = array<i64: 8, 16>}]} {
    %c0 = arith.constant 0 : index
    %c0_0 = arith.constant 0 : index
    %0 = vector.load %arg1[%c0, %c0_0] : memref<8x32xf32, #tpu.memory_space<vmem>>, vector<8x32xf32>
    %c0_1 = arith.constant 0 : index
    %c0_2 = arith.constant 0 : index
    %1 = vector.load %arg2[%c0_1, %c0_2] : memref<32x16xf32, #tpu.memory_space<vmem>>, vector<32x16xf32>
    %cst = arith.constant dense<0.000000e+00> : vector<8x16xf32>
    %2 = tpu.matmul %0, %1, %cst {dimension_numbers = #tpu.dot_dimension_numbers<[1], [0], [0], [1], [0, 0, 1, 1], [], []>} : vector<8x32xf32>, vector<32x16xf32>, vector<8x16xf32> -> vector<8x16xf32>
    %cst_3 = arith.constant 0.000000e+00 : f32
    %3 = vector.broadcast %cst_3 : f32 to vector<8x16xf32>
    %4 = arith.maximumf %2, %3 : vector<8x16xf32>
    %c0_4 = arith.constant 0 : index
    %c0_5 = arith.constant 0 : index
    %5 = vector.load %arg3[%c0_4, %c0_5] : memref<8x16xf32, #tpu.memory_space<vmem>>, vector<8x16xf32>
    tpu.vector_store %arg3[%c0_4, %c0_5], %4 {strides = array<i32>} : memref<8x16xf32, #tpu.memory_space<vmem>>, vector<8x16xf32>,
    return
  }
  func.func @transform_0(%arg0: i32) -> (i32, i32) {
    %c0_i32 = arith.constant 0 : i32
    %c0_i32_0 = arith.constant 0 : i32
    return %arg0, %c0_i32 : i32, i32
  }
  func.func @transform_1(%arg0: i32) -> (i32, i32) {
    %c0_i32 = arith.constant 0 : i32
    %c0_i32_0 = arith.constant 0 : i32
    %c0_i32_1 = arith.constant 0 : i32
    return %c0_i32, %c0_i32_0 : i32, i32
  }
  func.func @transform_2(%arg0: i32) -> (i32, i32) {
    %c0_i32 = arith.constant 0 : i32
    %c0_i32_0 = arith.constant 0 : i32
    return %arg0, %c0_i32 : i32, i32
  }
}

</mosaic_0001>

<bundles_post_ra>
// kernel: mlp_top_model.1
= control target key start
LH: loop header
LB: loop body
LE: loop exit
PB: predicated region body
PF: predicated region fallthrough
CT: control target
= control target key end

     0   :  { %v159_v3 = vmov 0.0|0.0   ;;  %vm160_vm0 = vmmov 0   ;;  %v161_v6 = vmov 0.0   ;;  %s205_s0 = inlined_call_operand.vmem [shape: f32[8,32], index: 0, kind: input, shape index: {}]   ;;  %s206_s1 = inlined_call_operand.vmem [shape: f32[32,16], index: 1, kind: input, shape index: {}]   ;;  %s207_s2 = inlined_call_operand.hbm [shape: f32[8,16], index: 2, kind: output, shape index: {}]  }
   0x1   :  { %v13_v0 = vld [vmem:[%s206_s1] sm:$0xff]  ;;  %v14_v1 = vld [vmem:[%s206_s1 + $0x8] sm:$0xff]  ;;  %v15_v2 = vld [vmem:[%s206_s1 + $0x10] sm:$0xff]  ;;  %125 = vmatprep.subr.bf16.mxu0 %v159_v3  ;;  %122 = vmatprep.mubr.msk.f32.mxu0 %vm160_vm0, %v161_v6 }
   0x2   :  { %v126_v4 = vpack.c.bf16 %v14_v1, %v13_v0  ;;  %v16_v5 = vld [vmem:[%s206_s1 + $0x18] sm:$0xff] }
   0x3   :  { %7 = vsyncpa [#allocation3], 0  ;;  %v129_v7 = vpack.c.bf16 %v16_v5, %v15_v2  ;;  %v12_v8 = vld [vmem:[%s205_s0] sm:$0xff]  ;;  %vm17_vm1 = vcmask 261120   ;;  %s162_s19 = smov [#allocation2]   ;;  %vm92_vm2 = vcmask 130048  }
   0x4   :  { %127 = vmatpush3.bf16.msra.mxu0 %v126_v4  ;;  %s100_s20 = sshll.u32 %s162_s19, 4  ;;  %s101_s20 = int_to_ptr.vmem [resolvable:$true] %s100_s20 }
   0x5   :  { %128 = vmatprep.subr.bf16.mxu0 %v159_v3  ;;  %s135_s1 = scalar_lea.vmem %s101_s20, 128  ;;  %p140_p1 = scmp.lt.s32.totalorder %s101_s20, %s101_s20 }
   0x6   :  { %p136_p0 = scmp.ne.s32.totalorder %s101_s20, %s135_s1  ;;  %p141_p2 = scmp.lt.s32.totalorder %s135_s1, %s135_s1 }
   0x8   :  { %130 = vmatpush3.bf16.msra.mxu0 %v129_v7  ;;  %p142_p3 = por %p141_p2, %p140_p1 }
   0xa   :  { %p143_p4 = pnand %p142_p3, %p136_p0 }
   0xb   :  { %123 = vmatmul.mubr.msk.f32.vlgmr.msra.gmra.mrb[0].mxu0 %vm17_vm1, %v12_v8 }
  0xde   :  { %v87_v9 = vpop.f32.mrb[0].mxu0 }
  0xdf   :  { %v91_v10 = vmax.f32 %v87_v9, 0.0  ;;  %v124_v11 = vpop.f32.mrb[1].mxu0 }
  0xe1   :  { %93 = vst.msk [vmem:[#allocation2] sm:$0xff] %vm92_vm2, %v91_v10 }
  0xe2   :  { %146 = shalt.err (!%p143_p4)
}
  0xe3   :  { %s147_s0 = scalar_lea.hbm %s207_s2, 128 }
  0xe4   :  { %p148_p5 = scmp.ne.s32.totalorder %s207_s2, %s147_s0  ;;  %p151_p6 = scmp.lt.u32.totalorder %s147_s0, %s207_s2 }
  0xe6   :  { %p153_p7 = pnand %p151_p6, %p148_p5 }
  0xe8   :  { %156 = shalt.err (!%p153_p7)
}
  0xe9   :  { %103 = dma.vmem_to_hbm [thread:$0]  %s101_s20, 128, %s207_s2, [#allocation3]  }
  0xea   :  { %157 = dma.done.wait [#allocation3], 128  }
  0xeb   :  { %158 = vsyncadd [#allocation3], 4294967168 }
  0xec   :  { %107 = vsyncpa [#allocation3], 1 }

</bundles_post_ra>
